<compile_context>
chip_gen: v7x
topology: tpu7x:2x2x1
jax: 0.10.0
libtpu: 0.0.40
codegen_flags: <defaults>
</compile_context>

<pallas_src>
import jax
import jax.numpy as jnp
from jax import lax
from jax.experimental import pallas as pl
from jax.experimental.pallas import tpu as pltpu


def _cosine_mse_partial_kernel(emb_ref, emb2_ref, lab_ref, out_ref):
    """Per-tile: cosine similarity along last dim -> partial sum of squared error.

    emb_ref, emb2_ref : (TB, D) VMEM tiles
    lab_ref           : (TB, 1) VMEM tile
    out_ref           : (1, 1)  SMEM output = this tile's sum of squared errors
    """
    x = emb_ref[...].astype(jnp.float32)
    y = emb2_ref[...].astype(jnp.float32)

    dot = jnp.sum(x * y, axis=-1, keepdims=True)   # (TB, 1)
    ss_x = jnp.sum(x * x, axis=-1, keepdims=True)  # (TB, 1)
    ss_y = jnp.sum(y * y, axis=-1, keepdims=True)  # (TB, 1)

    # torch.cosine_similarity clamps each norm at eps=1e-8:
    #   1 / max(||x||, eps) == rsqrt(max(||x||^2, eps^2))
    eps_sq = jnp.float32(1e-16)
    inv_nx = lax.rsqrt(jnp.maximum(ss_x, eps_sq))  # EUP, not VALU divide
    inv_ny = lax.rsqrt(jnp.maximum(ss_y, eps_sq))
    sim = dot * inv_nx * inv_ny                    # (TB, 1)

    err = sim - lab_ref[...].astype(jnp.float32)   # (TB, 1)
    # One cross-lane reduce per (large) tile -> negligible; no accumulator
    # dependency chain across grid steps, grid axis stays "parallel".
    out_ref[0, 0] = jnp.sum(err * err)


def _physical_vmem_bytes():
    """Best-effort physical VMEM query; conservative fallback works everywhere."""
    try:
        info = pltpu.get_tpu_info()
        for attr in ("vmem_capacity_bytes", "vmem_bytes", "vmem_size_bytes"):
            v = getattr(info, attr, None)
            if v:
                return int(v)
    except Exception:
        pass
    # Conservative: v7x has 64 MiB per TensorCore (v5e/v6e have 128 MiB).
    return 64 * 1024 * 1024


def _choose_batch_tile(B, D, in_bytes, vmem_budget_bytes):
    """Largest batch tile whose working set fits the VMEM budget.

    Per-row footprint: the two (tb, D) input streams are double-buffered by the
    Pallas pipeline (x2 each), and ~3 f32 (tb, D) temporaries (x*y, x*x, y*y)
    live simultaneously before their reductions.
    """
    per_row = D * (4 * in_bytes + 3 * 4) + 16       # + labels / per-row scalars
    tb = max(8, vmem_budget_bytes // per_row)
    tb = min(tb, 2048)                               # amortization saturates here
    tb = min(tb, -(-B // 8) * 8)                     # don't tile past the batch
    return max(8, (tb // 8) * 8)                     # sublane multiple


def cosine_similarity_mse_loss(embeddings, embeddings_, labels, *, tb=None):
    """Pallas implementation of CosineSimilarityLoss (MSE over cosine similarities)."""
    B, D = embeddings.shape
    assert embeddings_.shape == (B, D)
    labels_flat = jnp.reshape(labels, (-1)).astype(jnp.float32)  # labels.view(-1)
    assert labels_flat.shape[0] == B

    phys_vmem = _physical_vmem_bytes()
    vmem_limit = int(phys_vmem * 0.75)       # 48 MiB on v7x, 96 MiB on v5e/v6e
    vmem_budget = int(phys_vmem * 0.45)      # headroom for pipeline + compiler

    in_bytes = jnp.dtype(embeddings.dtype).itemsize
    if tb is None:
        tb = _choose_batch_tile(B, D, in_bytes, vmem_budget)
    tb = max(8, (min(tb, -(-B // 8) * 8) // 8) * 8)

    num_tiles = -(-B // tb)
    Bp = num_tiles * tb
    if Bp != B:
        pad = Bp - B
        # Zero rows -> sim = 0, zero label -> zero squared error: padding is exact.
        embeddings = jnp.pad(embeddings, ((0, pad), (0, 0)))
        embeddings_ = jnp.pad(embeddings_, ((0, pad), (0, 0)))
        labels_flat = jnp.pad(labels_flat, (0, pad))

    # Labels stay a (Bp, 1) column; at large tb the per-step label DMA (tb*4 B)
    # is fully amortized against the two tb*D embedding streams.
    labels2d = labels_flat.reshape(Bp, 1)

    partials = pl.pallas_call(
        _cosine_mse_partial_kernel,
        out_shape=jax.ShapeDtypeStruct((num_tiles, 1), jnp.float32),
        grid_spec=pltpu.PrefetchScalarGridSpec(
            num_scalar_prefetch=0,
            grid=(num_tiles,),
            in_specs=[
                pl.BlockSpec((tb, D), lambda i: (i, 0)),
                pl.BlockSpec((tb, D), lambda i: (i, 0)),
                pl.BlockSpec((tb, 1), lambda i: (i, 0)),
            ],
            # Each tile owns its own (1,1) SMEM output element -> no accumulator,
            # no cross-step dependency, grid axis can be sharded across TCs.
            out_specs=pl.BlockSpec((1, 1), lambda i: (i, 0), memory_space=pltpu.SMEM),
        ),
        compiler_params=pltpu.CompilerParams(
            dimension_semantics=("parallel",),
            vmem_limit_bytes=vmem_limit,
        ),
    )(embeddings, embeddings_, labels2d)

    # Tiny epilogue outside the kernel: sum of per-tile SSE, mean over TRUE batch.
    return jnp.sum(partials) / jnp.float32(B)


def _reference(embeddings, embeddings_, labels):
    """Pure-JAX reference mirroring torch.cosine_similarity + nn.MSELoss."""
    eps = 1e-8
    dot = jnp.sum(embeddings * embeddings_, axis=-1)
    nx = jnp.maximum(jnp.linalg.norm(embeddings, axis=-1), eps)
    ny = jnp.maximum(jnp.linalg.norm(embeddings_, axis=-1), eps)
    sim = dot / (nx * ny)
    return jnp.mean((sim - labels.reshape(-1)) ** 2)


if __name__ == "__main__":
    key = jax.random.PRNGKey(0)
    k1, k2, k3 = jax.random.split(key, 3)

    B, D = 16, 64  # small shapes: batch=16 sentence pairs, hidden=64
    embeddings = jax.random.normal(k1, (B, D), dtype=jnp.float32)
    embeddings_ = jax.random.normal(k2, (B, D), dtype=jnp.float32)
    labels = jax.random.uniform(k3, (B,), dtype=jnp.float32)  # target similarities

    loss = cosine_similarity_mse_loss(embeddings, embeddings_, labels)
    loss = jax.block_until_ready(loss)

    ref = _reference(embeddings, embeddings_, labels)
    assert jnp.allclose(loss, ref, rtol=1e-4, atol=1e-5), (loss, ref)

    print("KERNEL_OK")
</pallas_src>

<mosaic_0001>
module attributes {stable_mosaic.version = 11 : i64} {
  func.func @_cosine_mse_partial_kernel(%arg0: i32, %arg1: memref<16x64xf32, #tpu.memory_space<vmem>>, %arg2: memref<16x64xf32, #tpu.memory_space<vmem>>, %arg3: memref<16x1xf32, #tpu.memory_space<vmem>>, %arg4: memref<1x1xf32, #tpu.memory_space<smem>>) attributes {dimension_semantics = [#tpu.dimension_semantics<parallel>], iteration_bounds = array<i64: 1>, scalar_prefetch = 0 : i64, scratch_operands = 0 : i64, tpu.core_type = #tpu.core_type<tc>, window_params = [{transform_indices = @transform_0, window_bounds = array<i64: 16, 64>}, {transform_indices = @transform_1, window_bounds = array<i64: 16, 64>}, {transform_indices = @transform_2, window_bounds = array<i64: 16, 1>}, {transform_indices = @transform_3, window_bounds = array<i64: 1, 1>}]} {
    %c0 = arith.constant 0 : index
    %c0_0 = arith.constant 0 : index
    %0 = vector.load %arg1[%c0, %c0_0] : memref<16x64xf32, #tpu.memory_space<vmem>>, vector<16x64xf32>
    %c0_1 = arith.constant 0 : index
    %c0_2 = arith.constant 0 : index
    %1 = vector.load %arg2[%c0_1, %c0_2] : memref<16x64xf32, #tpu.memory_space<vmem>>, vector<16x64xf32>
    %2 = arith.mulf %0, %1 : vector<16x64xf32>
    %cst = arith.constant dense<0.000000e+00> : vector<16xf32>
    %3 = vector.multi_reduction <add>, %2, %cst [1] : vector<16x64xf32> to vector<16xf32>
    %4 = vector.shape_cast %3 : vector<16xf32> to vector<16x1xf32>
    %5 = arith.mulf %0, %0 : vector<16x64xf32>
    %cst_3 = arith.constant dense<0.000000e+00> : vector<16xf32>
    %6 = vector.multi_reduction <add>, %5, %cst_3 [1] : vector<16x64xf32> to vector<16xf32>
    %7 = vector.shape_cast %6 : vector<16xf32> to vector<16x1xf32>
    %8 = arith.mulf %1, %1 : vector<16x64xf32>
    %cst_4 = arith.constant dense<0.000000e+00> : vector<16xf32>
    %9 = vector.multi_reduction <add>, %8, %cst_4 [1] : vector<16x64xf32> to vector<16xf32>
    %10 = vector.shape_cast %9 : vector<16xf32> to vector<16x1xf32>
    %cst_5 = arith.constant 1.000000e-16 : f32
    %11 = vector.broadcast %cst_5 : f32 to vector<16x1xf32>
    %12 = arith.maximumf %7, %11 : vector<16x1xf32>
    %13 = math.rsqrt %12 : vector<16x1xf32>
    %cst_6 = arith.constant 1.000000e-16 : f32
    %14 = vector.broadcast %cst_6 : f32 to vector<16x1xf32>
    %15 = arith.maximumf %10, %14 : vector<16x1xf32>
    %16 = math.rsqrt %15 : vector<16x1xf32>
    %17 = arith.mulf %4, %13 : vector<16x1xf32>
    %18 = arith.mulf %17, %16 : vector<16x1xf32>
    %c0_7 = arith.constant 0 : index
    %c0_8 = arith.constant 0 : index
    %19 = vector.load %arg3[%c0_7, %c0_8] : memref<16x1xf32, #tpu.memory_space<vmem>>, vector<16x1xf32>
    %20 = arith.subf %18, %19 : vector<16x1xf32>
    %21 = arith.mulf %20, %20 : vector<16x1xf32>
    %22 = vector.shape_cast %21 : vector<16x1xf32> to vector<1x16x1xf32>
    %cst_9 = arith.constant dense<0.000000e+00> : vector<1xf32>
    %23 = vector.multi_reduction <add>, %22, %cst_9 [1, 2] : vector<1x16x1xf32> to vector<1xf32>
    %24 = vector.shape_cast %23 : vector<1xf32> to vector<1x1x1xf32>
    %25 = vector.extract %24[0, 0, 0] : f32 from vector<1x1x1xf32>
    %c0_10 = arith.constant 0 : index
    %c0_11 = arith.constant 0 : index
    %26 = memref.load %arg4[%c0_10, %c0_11] : memref<1x1xf32, #tpu.memory_space<smem>>
    memref.store %25, %arg4[%c0_10, %c0_11] : memref<1x1xf32, #tpu.memory_space<smem>>
    return
  }
  func.func @transform_0(%arg0: i32) -> (i32, i32) {
    %c0_i32 = arith.constant 0 : i32
    %c0_i32_0 = arith.constant 0 : i32
    return %arg0, %c0_i32 : i32, i32
  }
  func.func @transform_1(%arg0: i32) -> (i32, i32) {
    %c0_i32 = arith.constant 0 : i32
    %c0_i32_0 = arith.constant 0 : i32
    return %arg0, %c0_i32 : i32, i32
  }
  func.func @transform_2(%arg0: i32) -> (i32, i32) {
    %c0_i32 = arith.constant 0 : i32
    %c0_i32_0 = arith.constant 0 : i32
    return %arg0, %c0_i32 : i32, i32
  }
  func.func @transform_3(%arg0: i32) -> (i32, i32) {
    %c0_i32 = arith.constant 0 : i32
    %c0_i32_0 = arith.constant 0 : i32
    return %arg0, %c0_i32 : i32, i32
  }
}

</mosaic_0001>

<bundles_post_ra>
// kernel: tpu_custom_call.1
= control target key start
LH: loop header
LB: loop body
LE: loop exit
PB: predicated region body
PF: predicated region fallthrough
CT: control target
= control target key end

     0   :  { %8 = vsyncpa [#allocation3], 0  ;;  %s221_s0 = inlined_call_operand.vmem [shape: f32[16,64], index: 0, kind: input, shape index: {}]   ;;  %s222_s1 = inlined_call_operand.hbm [shape: f32[16,64], index: 1, kind: input, shape index: {}]   ;;  %s223_s2 = inlined_call_operand.vmem [shape: f32[16,1], index: 2, kind: input, shape index: {}]   ;;  %s224_s3 = inlined_call_operand.hbm [shape: f32[1,1], index: 3, kind: output, shape index: {}]  }
   0x1   :  { %9 = vsyncpa [#allocation4], 0  ;;  %s155_s12 = smov [#allocation2]   ;;  %s119_s16 = scalar_lea.hbm %s222_s1, 256 }
   0x2   :  { %s17_s13 = sshll.u32 %s155_s12, 4  ;;  %p120_p0 = scmp.ne.s32.totalorder %s222_s1, %s119_s16  ;;  %s18_s13 = int_to_ptr.vmem [resolvable:$true] %s17_s13 }
   0x3   :  { %p123_p1 = scmp.lt.u32.totalorder %s119_s16, %s222_s1 }
   0x5   :  { %p125_p2 = pnand %p123_p1, %p120_p0 }
   0x7   :  { %128 = shalt.err (!%p125_p2)
}
   0x8   :  { %s129_s21 = scalar_lea.vmem %s18_s13, 256  ;;  %p134_p4 = scmp.lt.s32.totalorder %s18_s13, %s18_s13 }
   0x9   :  { %p130_p3 = scmp.ne.s32.totalorder %s18_s13, %s129_s21  ;;  %p135_p5 = scmp.lt.s32.totalorder %s129_s21, %s129_s21 }
   0xb   :  { %p136_p6 = por %p135_p5, %p134_p4 }
   0xd   :  { %p137_p7 = pnand %p136_p6, %p130_p3 }
   0xf   :  { %140 = shalt.err (!%p137_p7)
}
  0x10   :  { %s156_s22 = smov 128   ;;  %s157_s23 = smov 8  }
  0x11   :  { %23 = dma.hbm_to_vmem [thread:$0]  %s222_s1, 256, %s18_s13, [#allocation3], %s156_s22, %s156_s22, %s157_s23  }
  0x12   :  { %151 = dma.done.wait [#allocation3], 256  }
  0x13   :  { %152 = vsyncadd [#allocation3], 4294967040  ;;  %v29_v0 = vld [vmem:[%s221_s0] sm:$0xff]  ;;  %vm35_vm0 = vcmask 523264   ;;  %v30_v2 = vld [vmem:[%s221_s0 + $0x8] sm:$0xff]  ;;  %vm76_vm1 = vcmask 7168  }
  0x14   :  { %v31_v1 = vld [vmem:[#allocation2] sm:$0xff]  ;;  %v42_v3 = vmul.f32 %v29_v0, %v29_v0  ;;  %v43_v5 = vmul.f32 %v30_v2, %v30_v2  ;;  %v32_v6 = vld [vmem:[#allocation2 + $0x8] sm:$0xff]  ;;  %s141_s7 = scalar_lea.hbm %s224_s3, 16 }
  0x15   :  { %v50_v4 = vmul.f32 %v31_v1, %v31_v1  ;;  %v51_v7 = vmul.f32 %v32_v6, %v32_v6  ;;  %v33_v12 = vmul.f32 %v31_v1, %v29_v0  ;;  %v34_v13 = vmul.f32 %v32_v6, %v30_v2  ;;  %v70_v28 = vld [vmem:[%s223_s2] sm:$0xff]  ;;  %v71_v35 = vld [vmem:[%s223_s2 + $0x8] sm:$0xff]  ;;  %p142_p8 = scmp.ne.s32.totalorder %s224_s3, %s141_s7  ;;  %p145_p9 = scmp.lt.u32.totalorder %s141_s7, %s224_s3 }
  0x16   :  { %v44_v8 = vsel %vm35_vm0, %v42_v3, 0.0  ;;  %v47_v10 = vsel %vm35_vm0, %v43_v5, 0.0 }
  0x17   :  { %v52_v9 = vsel %vm35_vm0, %v50_v4, 0.0  ;;  %45 = vadd.xlane.f32.xlu0 %v44_v8  ;;  %v55_v11 = vsel %vm35_vm0, %v51_v7, 0.0  ;;  %v36_v14 = vsel %vm35_vm0, %v33_v12, 0.0  ;;  %v39_v15 = vsel %vm35_vm0, %v34_v13, 0.0  ;;  %p147_p10 = pnand %p145_p9, %p142_p8 }
  0x18   :  { %53 = vadd.xlane.f32.xlu1 %v52_v9 }
  0x1b   :  { %48 = vadd.xlane.f32.xlu0 %v47_v10 }
  0x1c   :  { %56 = vadd.xlane.f32.xlu1 %v55_v11 }
  0x1f   :  { %37 = vadd.xlane.f32.xlu0 %v36_v14 }
  0x20   :  { %40 = vadd.xlane.f32.xlu1 %v39_v15 }
  0xa4   :  { %v46_v16 = vpop.xlane.xlu0 %45 }
  0xa5   :  { %v54_v17 = vpop.xlane.xlu1 %53  ;;  %v58_v18 = vmax.f32 %v46_v16, 1e-16 }
  0xa6   :  { %v62_v19 = vmax.f32 %v54_v17, 1e-16 }
  0xa7   :  { %111 = vrsqrt.f32 %v58_v18 }
  0xa8   :  { %113 = vrsqrt.f32 %v62_v19  ;;  %v49_v20 = vpop.xlane.xlu0 %48 }
  0xa9   :  { %v57_v21 = vpop.xlane.xlu1 %56  ;;  %v59_v22 = vmax.f32 %v49_v20, 1e-16 }
  0xaa   :  { %v63_v23 = vmax.f32 %v57_v21, 1e-16 }
  0xab   :  { %115 = vrsqrt.f32 %v59_v22 }
  0xac   :  { %117 = vrsqrt.f32 %v63_v23  ;;  %v38_v24 = vpop.xlane.xlu0 %37 }
  0xad   :  { %v41_v29 = vpop.xlane.xlu1 %40 }
  0xb1   :  { %v112_v25 = vpop.eup %111 }
  0xb2   :  { %v114_v26 = vpop.eup %113  ;;  %v66_v27 = vmul.f32 %v112_v25, %v38_v24 }
  0xb4   :  { %v68_v30 = vmul.f32 %v114_v26, %v66_v27 }
  0xb5   :  { %v116_v31 = vpop.eup %115 }
  0xb6   :  { %v118_v32 = vpop.eup %117  ;;  %v72_v33 = vsub.f32 %v68_v30, %v70_v28  ;;  %v67_v34 = vmul.f32 %v116_v31, %v41_v29 }
  0xb8   :  { %v69_v36 = vmul.f32 %v118_v32, %v67_v34  ;;  %v74_v38 = vmul.f32 %v72_v33, %v72_v33 }
  0xba   :  { %v73_v37 = vsub.f32 %v69_v36, %v71_v35  ;;  %v77_v40 = vsel %vm76_vm1, %v74_v38, 0.0 }
  0xbc   :  { %v75_v39 = vmul.f32 %v73_v37, %v73_v37 }
  0xbe   :  { %v78_v41 = vsel %vm76_vm1, %v75_v39, 0.0 }
  0xbf   :  { %v79_v42 = vadd.f32 %v78_v41, %v77_v40 }
  0xc1   :  { %80 = vadd.xlane.f32.xlu0 %v79_v42 }
 0x14e   :  { %v81_v43 = vpop.xlane.xlu0 %80 }
 0x14f   :  { %v82_v44 = vrot.slane %v81_v43, 4 }
 0x151   :  { %v83_v45 = vadd.f32 %v82_v44, %v81_v43 }
 0x153   :  { %v84_v46 = vrot.slane %v83_v45, 2 }
 0x155   :  { %v85_v47 = vadd.f32 %v84_v46, %v83_v45 }
 0x157   :  { %v86_v48 = vrot.slane %v85_v47, 1 }
 0x159   :  { %v87_v49 = vadd.f32 %v86_v48, %v85_v47 }
 0x15b   :  { %105 = vpush %v87_v49 }
 0x18c   :  { %s106_s5 = spop %105 }
 0x18d   :  { %90 = sst [smem:[#allocation5]] %s106_s5 }
 0x18e   :  { %150 = shalt.err (!%p147_p10)
}
 0x18f   :  { %s158_s12 = smov [#allocation5]  }
 0x190   :  { %98 = dma.smem_to_hbm %s158_s12, 16, %s224_s3, [#allocation4]  }
 0x191   :  { %153 = dma.done.wait [#allocation4], 16  }
 0x192   :  { %154 = vsyncadd [#allocation4], 4294967280 }
 0x193   :  { %102 = sfence }
 0x194   :  { %103 = vsyncpa [#allocation3], 1 }
 0x195   :  { %104 = vsyncpa [#allocation4], 1 }

</bundles_post_ra>
